<compile_context>
chip_gen: v7x
topology: tpu7x:2x2x1
jax: 0.10.0
libtpu: 0.0.40
codegen_flags: <defaults>
</compile_context>

<pallas_src>
import jax
import jax.numpy as jnp
from jax.experimental import pallas as pl
from jax.experimental.pallas import tpu as pltpu


def _round_up(v, m):
    return ((v + m - 1) // m) * m


def _softplus(x):
    # PyTorch Softplus(beta=1, threshold=20): x if x > 20 else log(1 + exp(x)).
    return jnp.where(x > 20.0, x, jnp.log1p(jnp.exp(jnp.minimum(x, 20.0))))


def _mlp_kernel(x_ref, w1_ref, b1_ref, w2_ref, b2_ref, w3_ref, b3_ref,
                w4_ref, b4_ref, o_ref):
    """4-layer MLP on one (block_m, x_in) batch tile."""
    x = x_ref[...]                      # (bm, x_in), f32
    x_in = x.shape[1]

    # ---- Layer 1. Contraction dim K = x_in is tiny (2): a matmul would pad
    # the MXU contraction dim to 128 (>98% zeros), so do unrolled VPU FMAs.
    if x_in <= 8:
        h = b1_ref[...].astype(jnp.float32)                       # (1, H) bcast
        for k in range(x_in):
            h = h + x[:, k:k + 1] * w1_ref[k:k + 1, :].astype(jnp.float32)
    else:
        h = jnp.dot(x, w1_ref[...].astype(jnp.float32),
                    preferred_element_type=jnp.float32) + b1_ref[...]

    # bf16 inputs (if the wrapper pre-cast the weights) with f32 accumulation.
    mm_dtype = w2_ref.dtype

    h = _softplus(h)
    h = jnp.dot(h.astype(mm_dtype), w2_ref[...],
                preferred_element_type=jnp.float32) + b2_ref[...]
    h = _softplus(h)
    h = jnp.dot(h.astype(mm_dtype), w3_ref[...],
                preferred_element_type=jnp.float32) + b3_ref[...]
    h = _softplus(h)
    h = jnp.dot(h.astype(mm_dtype), w4_ref[...],
                preferred_element_type=jnp.float32) + b4_ref[...]

    o_ref[...] = h.astype(o_ref.dtype)


def model_latent_f(x, params, *, block_m=1024, use_bf16=False):
    """Forward pass of ModelLatentF.

    Args:
      x: (N, x_in) float32 array (any N; padded internally).
      params: dict with w1..w4 shaped (in, out) and b1..b4 shaped (1, out),
              i.e. nn.Linear weights pre-transposed so the kernel does x @ W + b.
      block_m: max batch tile (rows per grid step).
      use_bf16: cast layer-2..4 weights/activations to bf16 (f32 accumulate)
                for the MXU fast path on v6e/v7x.
    Returns:
      (N, x_out) float32 array.
    """
    n, x_in = x.shape
    x_out = params["w4"].shape[1]

    # Large tile for pipeline efficiency, but keep >=2 grid steps (v7x has two
    # TensorCores that shard a "parallel" grid axis).
    bm = min(block_m, max(8, _round_up(pl.cdiv(n, 2), 8)))
    n_pad = _round_up(n, bm)

    # Lane-dense output: pad x_out up to a multiple of 128.
    out_pad = _round_up(x_out, 128)

    x_p = x if n_pad == n else jnp.pad(x, ((0, n_pad - n), (0, 0)))

    w_dtype = jnp.bfloat16 if use_bf16 else jnp.float32
    w1 = params["w1"].astype(jnp.float32)            # consumed on the VPU
    b1 = params["b1"].astype(jnp.float32)
    w2 = params["w2"].astype(w_dtype)
    b2 = params["b2"].astype(jnp.float32)
    w3 = params["w3"].astype(w_dtype)
    b3 = params["b3"].astype(jnp.float32)
    w4 = jnp.pad(params["w4"], ((0, 0), (0, out_pad - x_out))).astype(w_dtype)
    b4 = jnp.pad(params["b4"], ((0, 0), (0, out_pad - x_out))).astype(jnp.float32)

    # Weights/biases: whole array, constant index_map -> resident across grid.
    full = lambda a: pl.BlockSpec(a.shape, lambda i: (0, 0))

    out = pl.pallas_call(
        _mlp_kernel,
        out_shape=jax.ShapeDtypeStruct((n_pad, out_pad), jnp.float32),
        grid_spec=pltpu.PrefetchScalarGridSpec(
            num_scalar_prefetch=0,
            grid=(n_pad // bm,),
            in_specs=[
                pl.BlockSpec((bm, x_in), lambda i: (i, 0)),       # x tile
                full(w1), full(b1),
                full(w2), full(b2),
                full(w3), full(b3),
                full(w4), full(b4),
            ],
            out_specs=pl.BlockSpec((bm, out_pad), lambda i: (i, 0)),
        ),
        compiler_params=pltpu.CompilerParams(
            dimension_semantics=("parallel",),
            vmem_limit_bytes=32 * 1024 * 1024,   # headroom for big tiles on v5e
        ),
    )(x_p, w1, b1, w2, b2, w3, b3, w4, b4)

    return out[:n, :x_out]


def init_params(key, x_in=2, H=50, x_out=50):
    """Deterministic init mimicking PyTorch Linear default U(-1/sqrt(fan_in), ...)."""
    dims = [(x_in, H), (H, H), (H, H), (H, x_out)]
    params = {}
    for idx, (fan_in, fan_out) in enumerate(dims, start=1):
        key, kw, kb = jax.random.split(key, 3)
        bound = 1.0 / (fan_in ** 0.5)
        params[f"w{idx}"] = jax.random.uniform(
            kw, (fan_in, fan_out), jnp.float32, -bound, bound)
        params[f"b{idx}"] = jax.random.uniform(
            kb, (1, fan_out), jnp.float32, -bound, bound)
    return params


def _reference(x, params):
    h = x
    for i in range(1, 5):
        h = h @ params[f"w{i}"] + params[f"b{i}"]
        if i < 4:
            h = _softplus(h)
    return h


if __name__ == "__main__":
    key = jax.random.PRNGKey(0)
    k_param, k_x = jax.random.split(key)

    x_in, H, x_out = 2, 50, 50
    batch = 16

    params = init_params(k_param, x_in=x_in, H=H, x_out=x_out)
    x = jax.random.normal(k_x, (batch, x_in), jnp.float32)

    ref = _reference(x, params)

    # f32 path (2 grid steps -> exercises megacore-style sharding on v7x).
    out = jax.block_until_ready(model_latent_f(x, params))
    assert out.shape == (batch, x_out)
    assert jnp.allclose(out, ref, atol=1e-3, rtol=1e-3), "f32 mismatch vs reference"

    # bf16-MXU fast path (v6e/v7x): looser tolerance vs f32 reference.
    out_bf16 = jax.block_until_ready(model_latent_f(x, params, use_bf16=True))
    assert out_bf16.shape == (batch, x_out)
    assert jnp.allclose(out_bf16, ref, atol=1e-1, rtol=1e-1), "bf16 mismatch vs reference"

    # Ragged batch: exercises the pad-and-slice path (no N % block_m assert).
    out_rag = jax.block_until_ready(model_latent_f(x[:13], params))
    assert out_rag.shape == (13, x_out)
    assert jnp.allclose(out_rag, ref[:13], atol=1e-3, rtol=1e-3), "ragged mismatch"

    print("KERNEL_OK")
</pallas_src>

<mosaic_0001>
module attributes {stable_mosaic.version = 11 : i64} {
  func.func @_mlp_kernel(%arg0: i32, %arg1: memref<8x2xf32, #tpu.memory_space<vmem>>, %arg2: memref<2x50xf32, #tpu.memory_space<vmem>>, %arg3: memref<1x50xf32, #tpu.memory_space<vmem>>, %arg4: memref<50x50xf32, #tpu.memory_space<vmem>>, %arg5: memref<1x50xf32, #tpu.memory_space<vmem>>, %arg6: memref<50x50xf32, #tpu.memory_space<vmem>>, %arg7: memref<1x50xf32, #tpu.memory_space<vmem>>, %arg8: memref<50x128xf32, #tpu.memory_space<vmem>>, %arg9: memref<1x128xf32, #tpu.memory_space<vmem>>, %arg10: memref<8x128xf32, #tpu.memory_space<vmem>>) attributes {dimension_semantics = [#tpu.dimension_semantics<parallel>], iteration_bounds = array<i64: 2>, scalar_prefetch = 0 : i64, scratch_operands = 0 : i64, tpu.core_type = #tpu.core_type<tc>, window_params = [{transform_indices = @transform_0, window_bounds = array<i64: 8, 2>}, {pipeline_mode = #tpu.pipeline_mode<synchronous>, transform_indices = @transform_1, window_bounds = array<i64: 2, 50>}, {pipeline_mode = #tpu.pipeline_mode<synchronous>, transform_indices = @transform_2, window_bounds = array<i64: 1, 50>}, {pipeline_mode = #tpu.pipeline_mode<synchronous>, transform_indices = @transform_3, window_bounds = array<i64: 50, 50>}, {pipeline_mode = #tpu.pipeline_mode<synchronous>, transform_indices = @transform_4, window_bounds = array<i64: 1, 50>}, {pipeline_mode = #tpu.pipeline_mode<synchronous>, transform_indices = @transform_5, window_bounds = array<i64: 50, 50>}, {pipeline_mode = #tpu.pipeline_mode<synchronous>, transform_indices = @transform_6, window_bounds = array<i64: 1, 50>}, {pipeline_mode = #tpu.pipeline_mode<synchronous>, transform_indices = @transform_7, window_bounds = array<i64: 50, 128>}, {pipeline_mode = #tpu.pipeline_mode<synchronous>, transform_indices = @transform_8, window_bounds = array<i64: 1, 128>}, {transform_indices = @transform_9, window_bounds = array<i64: 8, 128>}]} {
    %c0 = arith.constant 0 : index
    %c0_0 = arith.constant 0 : index
    %0 = vector.load %arg1[%c0, %c0_0] : memref<8x2xf32, #tpu.memory_space<vmem>>, vector<8x2xf32>
    %c0_1 = arith.constant 0 : index
    %c0_2 = arith.constant 0 : index
    %1 = vector.load %arg3[%c0_1, %c0_2] : memref<1x50xf32, #tpu.memory_space<vmem>>, vector<1x50xf32>
    %2 = vector.extract_strided_slice %0 {offsets = [0, 0], sizes = [8, 1], strides = [1, 1]} : vector<8x2xf32> to vector<8x1xf32>
    %c0_3 = arith.constant 0 : index
    %c0_4 = arith.constant 0 : index
    %3 = vector.load %arg2[%c0_3, %c0_4] : memref<2x50xf32, #tpu.memory_space<vmem>>, vector<1x50xf32>
    %4 = vector.broadcast %2 : vector<8x1xf32> to vector<8x50xf32>
    %5 = vector.broadcast %3 : vector<1x50xf32> to vector<8x50xf32>
    %6 = arith.mulf %4, %5 : vector<8x50xf32>
    %7 = vector.broadcast %1 : vector<1x50xf32> to vector<8x50xf32>
    %8 = arith.addf %7, %6 : vector<8x50xf32>
    %9 = vector.extract_strided_slice %0 {offsets = [0, 1], sizes = [8, 1], strides = [1, 1]} : vector<8x2xf32> to vector<8x1xf32>
    %c1 = arith.constant 1 : index
    %c0_5 = arith.constant 0 : index
    %10 = vector.load %arg2[%c1, %c0_5] : memref<2x50xf32, #tpu.memory_space<vmem>>, vector<1x50xf32>
    %11 = vector.broadcast %9 : vector<8x1xf32> to vector<8x50xf32>
    %12 = vector.broadcast %10 : vector<1x50xf32> to vector<8x50xf32>
    %13 = arith.mulf %11, %12 : vector<8x50xf32>
    %14 = arith.addf %8, %13 : vector<8x50xf32>
    %cst = arith.constant 2.000000e+01 : f32
    %15 = vector.broadcast %cst : f32 to vector<8x50xf32>
    %16 = arith.cmpf ogt, %14, %15 : vector<8x50xf32>
    %cst_6 = arith.constant 2.000000e+01 : f32
    %17 = vector.broadcast %cst_6 : f32 to vector<8x50xf32>
    %18 = arith.minimumf %14, %17 : vector<8x50xf32>
    %19 = math.exp %18 : vector<8x50xf32>
    %20 = math.log1p %19 : vector<8x50xf32>
    %21 = arith.select %16, %14, %20 : vector<8x50xi1>, vector<8x50xf32>
    %c0_7 = arith.constant 0 : index
    %c0_8 = arith.constant 0 : index
    %22 = vector.load %arg4[%c0_7, %c0_8] : memref<50x50xf32, #tpu.memory_space<vmem>>, vector<50x50xf32>
    %cst_9 = arith.constant dense<0.000000e+00> : vector<8x50xf32>
    %23 = tpu.matmul %21, %22, %cst_9 {dimension_numbers = #tpu.dot_dimension_numbers<[1], [0], [0], [1], [0, 0, 1, 1], [], []>} : vector<8x50xf32>, vector<50x50xf32>, vector<8x50xf32> -> vector<8x50xf32>
    %c0_10 = arith.constant 0 : index
    %c0_11 = arith.constant 0 : index
    %24 = vector.load %arg5[%c0_10, %c0_11] : memref<1x50xf32, #tpu.memory_space<vmem>>, vector<1x50xf32>
    %25 = vector.broadcast %24 : vector<1x50xf32> to vector<8x50xf32>
    %26 = arith.addf %23, %25 : vector<8x50xf32>
    %cst_12 = arith.constant 2.000000e+01 : f32
    %27 = vector.broadcast %cst_12 : f32 to vector<8x50xf32>
    %28 = arith.cmpf ogt, %26, %27 : vector<8x50xf32>
    %cst_13 = arith.constant 2.000000e+01 : f32
    %29 = vector.broadcast %cst_13 : f32 to vector<8x50xf32>
    %30 = arith.minimumf %26, %29 : vector<8x50xf32>
    %31 = math.exp %30 : vector<8x50xf32>
    %32 = math.log1p %31 : vector<8x50xf32>
    %33 = arith.select %28, %26, %32 : vector<8x50xi1>, vector<8x50xf32>
    %c0_14 = arith.constant 0 : index
    %c0_15 = arith.constant 0 : index
    %34 = vector.load %arg6[%c0_14, %c0_15] : memref<50x50xf32, #tpu.memory_space<vmem>>, vector<50x50xf32>
    %cst_16 = arith.constant dense<0.000000e+00> : vector<8x50xf32>
    %35 = tpu.matmul %33, %34, %cst_16 {dimension_numbers = #tpu.dot_dimension_numbers<[1], [0], [0], [1], [0, 0, 1, 1], [], []>} : vector<8x50xf32>, vector<50x50xf32>, vector<8x50xf32> -> vector<8x50xf32>
    %c0_17 = arith.constant 0 : index
    %c0_18 = arith.constant 0 : index
    %36 = vector.load %arg7[%c0_17, %c0_18] : memref<1x50xf32, #tpu.memory_space<vmem>>, vector<1x50xf32>
    %37 = vector.broadcast %36 : vector<1x50xf32> to vector<8x50xf32>
    %38 = arith.addf %35, %37 : vector<8x50xf32>
    %cst_19 = arith.constant 2.000000e+01 : f32
    %39 = vector.broadcast %cst_19 : f32 to vector<8x50xf32>
    %40 = arith.cmpf ogt, %38, %39 : vector<8x50xf32>
    %cst_20 = arith.constant 2.000000e+01 : f32
    %41 = vector.broadcast %cst_20 : f32 to vector<8x50xf32>
    %42 = arith.minimumf %38, %41 : vector<8x50xf32>
    %43 = math.exp %42 : vector<8x50xf32>
    %44 = math.log1p %43 : vector<8x50xf32>
    %45 = arith.select %40, %38, %44 : vector<8x50xi1>, vector<8x50xf32>
    %c0_21 = arith.constant 0 : index
    %c0_22 = arith.constant 0 : index
    %46 = vector.load %arg8[%c0_21, %c0_22] : memref<50x128xf32, #tpu.memory_space<vmem>>, vector<50x128xf32>
    %cst_23 = arith.constant dense<0.000000e+00> : vector<8x128xf32>
    %47 = tpu.matmul %45, %46, %cst_23 {dimension_numbers = #tpu.dot_dimension_numbers<[1], [0], [0], [1], [0, 0, 1, 1], [], []>} : vector<8x50xf32>, vector<50x128xf32>, vector<8x128xf32> -> vector<8x128xf32>
    %c0_24 = arith.constant 0 : index
    %c0_25 = arith.constant 0 : index
    %48 = vector.load %arg9[%c0_24, %c0_25] : memref<1x128xf32, #tpu.memory_space<vmem>>, vector<1x128xf32>
    %49 = vector.broadcast %48 : vector<1x128xf32> to vector<8x128xf32>
    %50 = arith.addf %47, %49 : vector<8x128xf32>
    %c0_26 = arith.constant 0 : index
    %c0_27 = arith.constant 0 : index
    %51 = vector.load %arg10[%c0_26, %c0_27] : memref<8x128xf32, #tpu.memory_space<vmem>>, vector<8x128xf32>
    tpu.vector_store %arg10[%c0_26, %c0_27], %50 {strides = array<i32>} : memref<8x128xf32, #tpu.memory_space<vmem>>, vector<8x128xf32>,
    return
  }
  func.func @transform_0(%arg0: i32) -> (i32, i32) {
    %c0_i32 = arith.constant 0 : i32
    %c0_i32_0 = arith.constant 0 : i32
    return %arg0, %c0_i32 : i32, i32
  }
  func.func @transform_1(%arg0: i32) -> (i32, i32) {
    %c0_i32 = arith.constant 0 : i32
    %c0_i32_0 = arith.constant 0 : i32
    %c0_i32_1 = arith.constant 0 : i32
    return %c0_i32, %c0_i32_0 : i32, i32
  }
  func.func @transform_2(%arg0: i32) -> (i32, i32) {
    %c0_i32 = arith.constant 0 : i32
    %c0_i32_0 = arith.constant 0 : i32
    %c0_i32_1 = arith.constant 0 : i32
    return %c0_i32, %c0_i32_0 : i32, i32
  }
  func.func @transform_3(%arg0: i32) -> (i32, i32) {
    %c0_i32 = arith.constant 0 : i32
    %c0_i32_0 = arith.constant 0 : i32
    %c0_i32_1 = arith.constant 0 : i32
    return %c0_i32, %c0_i32_0 : i32, i32
  }
  func.func @transform_4(%arg0: i32) -> (i32, i32) {
    %c0_i32 = arith.constant 0 : i32
    %c0_i32_0 = arith.constant 0 : i32
    %c0_i32_1 = arith.constant 0 : i32
    return %c0_i32, %c0_i32_0 : i32, i32
  }
  func.func @transform_5(%arg0: i32) -> (i32, i32) {
    %c0_i32 = arith.constant 0 : i32
    %c0_i32_0 = arith.constant 0 : i32
    %c0_i32_1 = arith.constant 0 : i32
    return %c0_i32, %c0_i32_0 : i32, i32
  }
  func.func @transform_6(%arg0: i32) -> (i32, i32) {
    %c0_i32 = arith.constant 0 : i32
    %c0_i32_0 = arith.constant 0 : i32
    %c0_i32_1 = arith.constant 0 : i32
    return %c0_i32, %c0_i32_0 : i32, i32
  }
  func.func @transform_7(%arg0: i32) -> (i32, i32) {
    %c0_i32 = arith.constant 0 : i32
    %c0_i32_0 = arith.constant 0 : i32
    %c0_i32_1 = arith.constant 0 : i32
    return %c0_i32, %c0_i32_0 : i32, i32
  }
  func.func @transform_8(%arg0: i32) -> (i32, i32) {
    %c0_i32 = arith.constant 0 : i32
    %c0_i32_0 = arith.constant 0 : i32
    %c0_i32_1 = arith.constant 0 : i32
    return %c0_i32, %c0_i32_0 : i32, i32
  }
  func.func @transform_9(%arg0: i32) -> (i32, i32) {
    %c0_i32 = arith.constant 0 : i32
    %c0_i32_0 = arith.constant 0 : i32
    return %arg0, %c0_i32 : i32, i32
  }
}

</mosaic_0001>

<bundles_post_ra>
// kernel: tpu_custom_call.1
= control target key start
LH: loop header
LB: loop body
LE: loop exit
PB: predicated region body
PF: predicated region fallthrough
CT: control target
= control target key end

     0   :  { %14 = vsyncpa [#allocation3], 0  ;;  %s1511_s0 = inlined_call_operand.vmem [shape: f32[16,2], index: 0, kind: input, shape index: {}]   ;;  %s1512_s1 = inlined_call_operand.vmem [shape: f32[2,50], index: 1, kind: input, shape index: {}]   ;;  %s1513_s2 = inlined_call_operand.vmem [shape: f32[1,50], index: 2, kind: input, shape index: {}]   ;;  %s1514_s3 = inlined_call_operand.hbm [shape: f32[50,50], index: 3, kind: input, shape index: {}]   ;;  %s1515_s4 = inlined_call_operand.vmem [shape: f32[1,50], index: 4, kind: input, shape index: {}]   ;;  %s1516_s5 = inlined_call_operand.hbm [shape: f32[50,50], index: 5, kind: input, shape index: {}]   ;;  %s1517_s6 = inlined_call_operand.vmem [shape: f32[1,50], index: 6, kind: input, shape index: {}]   ;;  %s1518_s7 = inlined_call_operand.hbm [shape: f32[50,128], index: 7, kind: input, shape index: {}]   ;;  %s1519_s8 = inlined_call_operand.vmem [shape: f32[1,128], index: 8, kind: input, shape index: {}]   ;;  %s1520_s9 = inlined_call_operand.hbm [shape: f32[16,128], index: 9, kind: output, shape index: {}]  }
   0x1   :  { %15 = vsyncpa [#allocation6], 0 }
   0x2   :  { %16 = vsyncpa [#allocation4], 0 }
   0x3   :  { %18 = vsyncpa [#allocation4 + $0x1], 0  ;;  %s1260_s30 = smov 0   ;;  %s1262_s10 = smov 0  }
   0x4   :  { %s1264_s11 = smov 0   ;;  %s1266_s12 = smov 0  }
   0x5 LB: > { %1529 = sst [smem:[#allocation12_spill]] %s1185_s30  ;;  %s1281_s13 = sadd.s32 4294967295, %s1197_s12   ;;  %s1197_s12 = sphi %s1266_s12, %s1548_s12   ;;  %s1193_s11 = sphi %s1264_s11, %s1553_s11   ;;  %s1189_s10 = sphi %s1262_s10, %s1552_s10   ;;  %s1185_s30 = sphi %s1260_s30, %s1551_s30  }
   0x6   : > { %1530 = sst [smem:[#allocation13_spill]] %s1193_s11  ;;  %s822_s14 = sadd.s32 4294967294, %s1197_s12  }
   0x7   : > { %s1285_s15 = sadd.s32 1, %s1197_s12   ;;  %s225_s16 = sadd.s32 1, %s1193_s11 }
   0x8   : > { %1531 = sst [smem:[#allocation14_spill]] %s1285_s15  ;;  %s222_s17 = ssub.s32 %s1197_s12, %s1285_s15 }
   0x9   : > { %p235_p0 = scmp.ne.s32.totalorder %s1193_s11, %s1189_s10  ;;  %p223_p1 = scmp.eq.s32.totalorder %s222_s17, 0 }
   0xa   : > { %p236_p2 = scmp.eq.s32.totalorder %s1281_s13, 1  ;;  %p241_p3 = scmp.ne.s32.totalorder %s1189_s10, %s1185_s30 }
   0xb   : > { %p242_p4 = scmp.eq.s32.totalorder %s822_s14, 1  ;;  %p823_p7 = scmp.ge.s32.totalorder %s1197_s12, 1 }
   0xc   : > { %s1296_s18 = scalar_select %p223_p1, %s1193_s11, %s225_s16  }
   0xd   : > { %p1298_p5 = por %p236_p2, %p235_p0  ;;  %p1302_p6 = por %p242_p4, %p241_p3 }
   0xe   : > { %1532 = sst [smem:[#allocation15_spill]] %s1296_s18  ;;  %p249_p8 = scmp.lt.s32.totalorder %s1197_s12, 3 }
   0xf   : > { %s1533_s19 = scalar_select %p1298_p5, 1, 0 }
  0x10   : > { %s1534_s20 = scalar_select %p1302_p6, 1, 0 }
  0x11   : > { %p1521_p9 = scmp.eq.s32.totalorder %s1281_s13, 0  ;;  %p1309_p10 = pnand %p823_p7, %p249_p8 }
  0x12   : > { %1535 = sst [smem:[#allocation16_spill]] %s1534_s20  ;;  %s1199_s22 = smov [#allocation5]  }
  0x13   : > { %s1536_s21 = scalar_select %p1309_p10, 1, 0 }
  0x14   : > { %p966_p11 = pneg %p1309_p10  ;;  %s283_s23 = sshll.u32 %s1199_s22, 4  ;;  %s1315_s23 = int_to_ptr.vmem [resolvable:$true] %s283_s23 }
  0x15   : > { %s1200_s25 = smov [#allocation2]   ;;  %s1201_s27 = smov [#allocation7]  }
  0x16   : > { %p1319_p12 = pnand %p1521_p9, %p966_p11  ;;  %s267_s26 = sshll.u32 %s1200_s25, 4  ;;  %s1323_s26 = int_to_ptr.vmem [resolvable:$true] %s267_s26 }
  0x17   : > { %s1325_s28 = sshll.u32 %s1201_s27, 4  ;;  %s1043_s16 = scalar_lea.hbm %s1516_s5, 896  ;;  %s300_s28 = int_to_ptr.vmem [resolvable:$true] %s1325_s28 }
  0x18   : > { %p1044_p13 = scmp.ne.s32.totalorder %s1516_s5, %s1043_s16  ;;  %p1335_p0 = pneg %p1319_p12 }
  0x19   : > { %p1050_p3 = scmp.lt.u32.totalorder %s1043_s16, %s1516_s5 }
  0x1a   : > { %p1046_p1 = pnand %p1335_p0, %p1044_p13 }
  0x1c   : > { %p1047_p2 = pneg %p1046_p1 }
  0x1e   : > { %p1052_p4 = pnand %p1050_p3, %p1047_p2 }
  0x20   : > { %1055 = shalt.err (!%p1052_p4)
}
  0x21   : > { %s1056_s29 = scalar_lea.vmem %s1315_s23, 896  ;;  %p1064_p9 = scmp.lt.s32.totalorder %s1315_s23, %s1315_s23 }
  0x22   : > { %p1057_p7 = scmp.ne.s32.totalorder %s1315_s23, %s1056_s29  ;;  %p1065_p6 = scmp.lt.s32.totalorder %s1056_s29, %s1056_s29 }
  0x24   : > { %p1059_p8 = pnand %p1057_p7, %p1335_p0  ;;  %p1066_p13 = por %p1065_p6, %p1064_p9 }
  0x26   : > { %p1060_p11 = pneg %p1059_p8 }
  0x28   : > { %p1067_p1 = pnand %p1066_p13, %p1060_p11 }
  0x2a   : > { %1070 = shalt.err (!%p1067_p1)
}
  0x2b   : > { %s1202_s14 = smov 128   ;;  %s1203_s16 = smov 8  }
  0x2c   : > { %972 = dma.hbm_to_vmem [thread:$0]  (!%p1319_p12), %s1516_s5, 896, %s1315_s23, [#allocation6], %s1202_s14, %s1202_s14, %s1203_s16  }
  0x2d   : > { %s1071_s29 = scalar_lea.hbm %s1514_s3, 896 }
  0x2e   : > { %p1072_p6 = scmp.ne.s32.totalorder %s1514_s3, %s1071_s29  ;;  %p1078_p3 = scmp.lt.u32.totalorder %s1071_s29, %s1514_s3 }
  0x30   : > { %p1074_p9 = pnand %p1072_p6, %p1335_p0 }
  0x32   : > { %p1075_p2 = pneg %p1074_p9 }
  0x34   : > { %p1080_p4 = pnand %p1078_p3, %p1075_p2 }
  0x36   : > { %1083 = shalt.err (!%p1080_p4)
}
  0x37   : > { %s1084_s23 = scalar_lea.vmem %s1323_s26, 896  ;;  %p1092_p13 = scmp.lt.s32.totalorder %s1323_s26, %s1323_s26 }
  0x38   : > { %p1085_p7 = scmp.ne.s32.totalorder %s1323_s26, %s1084_s23  ;;  %p1093_p1 = scmp.lt.s32.totalorder %s1084_s23, %s1084_s23 }
  0x3a   : > { %p1087_p8 = pnand %p1085_p7, %p1335_p0  ;;  %p1094_p6 = por %p1093_p1, %p1092_p13 }
  0x3c   : > { %p1088_p11 = pneg %p1087_p8 }
  0x3e   : > { %p1095_p9 = pnand %p1094_p6, %p1088_p11 }
  0x40   : > { %1098 = shalt.err (!%p1095_p9)
}
  0x41   : > { %969 = dma.hbm_to_vmem [thread:$0]  (!%p1319_p12), %s1514_s3, 896, %s1323_s26, [#allocation3], %s1202_s14, %s1202_s14, %s1203_s16  }
  0x42   : > { %s1099_s17 = scalar_lea.hbm %s1518_s7, 896 }
  0x43   : > { %p1100_p2 = scmp.ne.s32.totalorder %s1518_s7, %s1099_s17  ;;  %p1106_p7 = scmp.lt.u32.totalorder %s1099_s17, %s1518_s7 }
  0x45   : > { %p1102_p3 = pnand %p1100_p2, %p1335_p0 }
  0x47   : > { %p1103_p4 = pneg %p1102_p3 }
  0x49   : > { %p1108_p8 = pnand %p1106_p7, %p1103_p4 }
  0x4b   : > { %1111 = shalt.err (!%p1108_p8)
}
  0x4c   : > { %s1112_s23 = scalar_lea.vmem %s300_s28, 896  ;;  %p1120_p6 = scmp.lt.s32.totalorder %s300_s28, %s300_s28 }
  0x4d   : > { %p1113_p11 = scmp.ne.s32.totalorder %s300_s28, %s1112_s23  ;;  %p1121_p9 = scmp.lt.s32.totalorder %s1112_s23, %s1112_s23 }
  0x4f   : > { %p1115_p13 = pnand %p1113_p11, %p1335_p0  ;;  %p1122_p5 = por %p1121_p9, %p1120_p6 }
  0x51   : > { %p1116_p1 = pneg %p1115_p13 }
  0x53   : > { %p1123_p10 = pnand %p1122_p5, %p1116_p1 }
  0x55   : > { %1126 = shalt.err (!%p1123_p10)
}
  0x56   : > { %975 = dma.hbm_to_vmem [thread:$0]  (!%p1319_p12), %s1518_s7, 896, %s300_s28, [#allocation6], %s1202_s14, %s1202_s14, %s1203_s16  }
  0x57   : > { %p1539_p2 = scmp.ne.s32.totalorder %s1536_s21, 0 }
  0x58   : > { %p1540_p0 = scmp.eq.s32.totalorder (!%p1539_p2), %s1281_s13, 0 }
  0x59   : > { %325 = sbr.rel (%p1539_p2) target bundleno = 996 (0x3e4), region = 56 }
  0x60   : > { %1172 = dma.done.wait (%p1540_p0), [#allocation3], 896   ;;  %p1541_p3 = pmov %p1540_p0 }
  0x61   : > { %p1542_p5 = pmov %p1540_p0 }
  0x62   : > { %1174 = vsyncadd (%p1541_p3), [#allocation3], 4294966400 }
  0x63   : > { %1176 = dma.done.wait (%p1542_p5), [#allocation6], 1792   ;;  %p1543_p10 = pmov %p1540_p0 }
  0x64   : > { %p368_p4 = scmp.lt.s32.totalorder %s1281_s13, 1  ;;  %v1204_v0 = vmov 0   ;;  %v1205_v2 = vmov 1   ;;  %v417_v3 = vld [vmem:[#allocation2] sm:$0xff]  ;;  %v418_v4 = vld [vmem:[#allocation2 + $0x8] sm:$0xff]  ;;  %v419_v5 = vld [vmem:[#allocation2 + $0x10] sm:$0xff] }
  0x65   : > { %1178 = vsyncadd (%p1543_p10), [#allocation6], 4294965504  ;;  %1029 = vset.pattern.permute.xlu0 %v1204_v0  ;;  %v1206_v6 = vmov 0.0|0.0   ;;  %v926_v7 = vpack.c.bf16 %v418_v4, %v417_v3  ;;  %v420_v8 = vld [vmem:[#allocation2 + $0x18] sm:$0xff]  ;;  %vm1207_vm0 = vmmov 0   ;;  %v1208_v9 = vmov 0.0  }
  0x66   : > { %s369_s18 = scalar_select %p368_p4, %s1281_s13, 1  ;;  %925 = vmatprep.subr.bf16.mxu0 %v1206_v6  ;;  %934 = vmatprep.subr.bf16.mxu1 %v1206_v6  ;;  %v929_v10 = vpack.c.bf16 %v420_v8, %v419_v5  ;;  %v421_v11 = vld [vmem:[#allocation2 + $0x20] sm:$0xff]  ;;  %v422_v12 = vld [vmem:[#allocation2 + $0x28] sm:$0xff]  ;;  %v423_v14 = vld [vmem:[#allocation2 + $0x30] sm:$0x3]  ;;  %vm435_vm1 = vcmask 1041408  }
  0x67   : > { %888 = vmatprep.mubr.msk.f32.mxu0 %vm1207_vm0, %v1208_v9  ;;  %905 = vmatprep.mubr.msk.f32.mxu1 %vm1207_vm0, %v1208_v9  ;;  %v932_v13 = vpack.c.bf16 %v422_v12, %v421_v11  ;;  %v834_v15 = vld [vmem:[%s1512_s1] ss:$0 sm:$0xff]  ;;  %v836_v19 = vld [vmem:[%s1512_s1 + $0x1] ss:$0 sm:$0xff]  ;;  %vm431_vm3 = vcmask 408576   ;;  %v523_v36 = vld [vmem:[#allocation5] sm:$0xff] }
  0x68   : > { %s833_s21 = sshll.u32 %s369_s18, 3  ;;  %927 = vmatpush3.bf16.msra.mxu0 %v926_v7  ;;  %v835_v18 = vld [vmem:[%s1513_s2] ss:$0 sm:$0xff]  ;;  %v524_v37 = vld [vmem:[#allocation5 + $0x8] sm:$0xff]  ;;  %v526_v40 = vld [vmem:[#allocation5 + $0x18] sm:$0xff]  ;;  %s365_s26 = sand.u32 1, %s1189_s10  }
  0x69   : > { %s371_s14 = scalar_lea.vmem %s1511_s0, %s833_s21  ;;  %928 = vmatprep.subr.bf16.mxu0 %v1206_v6  ;;  %v525_v38 = vld [vmem:[#allocation5 + $0x10] sm:$0xff]  ;;  %v935_v39 = vpack.c.bf16 %v524_v37, %v523_v36  ;;  %v527_v42 = vld [vmem:[#allocation5 + $0x20] sm:$0xff]  ;;  %v528_v43 = vld [vmem:[#allocation5 + $0x28] sm:$0xff]  ;;  %s832_s30 = sshll.u32 %s365_s26, 3 }
  0x6a   : > { %v372_v1 = vld [vmem:[%s371_s14] sm:$0xff]  ;;  %v938_v41 = vpack.c.bf16 %v526_v40, %v525_v38  ;;  %v941_v44 = vpack.c.bf16 %v528_v43, %v527_v42  ;;  %v627_v62 = vld [vmem:[#allocation7] sm:$0xff]  ;;  %v628_v63 = vld [vmem:[#allocation7 + $0x8] sm:$0xff]  ;;  %s847_s24 = sshll.u32 %s1281_s13, 7  ;;  %s367_s28 = scalar_lea.vmem [#allocation8], %s832_s30 }
  0x6b   : > { %377 = vperm.xlu0 %1029, %v372_v1   ;;  %936 = vmatpush3.bf16.msra.mxu1 %v935_v39  ;;  %v529_v45 = vld [vmem:[#allocation5 + $0x30] sm:$0x3]  ;;  %v944_v0 = vpack.c.bf16 %v628_v63, %v627_v62  ;;  %v631_v4 = vld [vmem:[#allocation7 + $0x20] sm:$0xff]  ;;  %v632_v5 = vld [vmem:[#allocation7 + $0x28] sm:$0xff]  ;;  %s732_s14 = sshll.u32 %s367_s28, 4  ;;  %s1469_s15 = scalar_lea.hbm %s1520_s9, %s847_s24  ;;  %s1471_s14 = int_to_ptr.vmem [resolvable:$true] %s732_s14 }
  0x6c   : > { %930 = vmatpush3.bf16.msra.mxu0 %v929_v10  ;;  %937 = vmatprep.subr.bf16.mxu1 %v1206_v6  ;;  %v837_v46 = vld [vmem:[%s1515_s4] ss:$0 sm:$0xff]  ;;  %v950_v7 = vpack.c.bf16 %v632_v5, %v631_v4  ;;  %v633_v8 = vld [vmem:[#allocation7 + $0x30] sm:$0x3]  ;;  %s719_s20 = scalar_lea.sflag [#allocation4], %s365_s26  ;;  %s1127_s17 = scalar_lea.vmem %s1471_s14, 128 }
  0x6d   : > { %931 = vmatprep.subr.bf16.mxu0 %v1206_v6  ;;  %v840_v10 = vld [vmem:[%s1517_s6] ss:$0 sm:$0xff]  ;;  %p1128_p12 = scmp.ne.s32.totalorder %s1471_s14, %s1127_s17  ;;  %p1544_p7 = scmp.ne.s32.totalorder %s1533_s19, 0 }
  0x6e   : > { %s1209_s13 = smov [#allocation8]  }
  0x6f   : > { %1030 = vset.pattern.permute.xlu0 %v1205_v2  ;;  %939 = vmatpush3.bf16.msra.mxu1 %v938_v41  ;;  %v630_v2 = vld [vmem:[#allocation7 + $0x18] sm:$0xff]  ;;  %p1129_p8 = pnand %p1128_p12, %p1544_p7  ;;  %s1131_s22 = sshll.u32 %s1209_s13, 4  ;;  %s1132_s22 = int_to_ptr.vmem [resolvable:$false] %s1131_s22 }
  0x70   : > { %394 = vperm.xlu0 %1030, %v372_v1   ;;  %933 = vmatpush3.bf16.msra.mxu0 %v932_v13  ;;  %v629_v1 = vld [vmem:[#allocation7 + $0x10] sm:$0xff]  ;;  %s1133_s25 = scalar_lea.vmem %s1132_s22, 256  ;;  %p1134_p13 = scmp.lt.s32.totalorder %s1471_s14, %s1132_s22 }
  0x71   : > { %886 = vmatprep.subr.mxu0 %v1208_v9  ;;  %940 = vmatprep.subr.bf16.mxu1 %v1206_v6  ;;  %v947_v3 = vpack.c.bf16 %v630_v2, %v629_v1  ;;  %p1130_p11 = pneg %p1129_p8  ;;  %p1135_p1 = scmp.lt.s32.totalorder %s1133_s25, %s1127_s17 }
  0x73   : > { %942 = vmatpush3.bf16.msra.mxu1 %v941_v44  ;;  %p1136_p6 = por %p1135_p1, %p1134_p13 }
  0x74   : > { %887 = vmatpush3.msk.msra.mxu0 %vm435_vm1, %v423_v14  ;;  %903 = vmatprep.subr.mxu1 %v1208_v9 }
  0x75   : > { %943 = vmatprep.subr.bf16.mxu0 %v1206_v6  ;;  %p1137_p9 = pnand %p1136_p6, %p1130_p11 }
  0x77   : > { %904 = vmatpush3.msk.msra.mxu1 %vm435_vm1, %v529_v45 }
  0xea   : > { %v378_v16 = vpop.permute.xlu0 %377 }
  0xeb   : > { %v384_v17 = vmul.f32 %v834_v15, %v378_v16 }
  0xed   : > { %v391_v21 = vadd.f32 %v835_v18, %v384_v17 }
  0xef   : > { %v395_v20 = vpop.permute.xlu0 %394 }
  0xf0   : > { %v401_v22 = vmul.f32 %v836_v19, %v395_v20 }
  0xf2   : > { %v402_v23 = vadd.f32 %v401_v22, %v391_v21 }
  0xf4   : > { %v404_v24 = vmin.f32 %v402_v23, 20.0  ;;  %vm403_vm4 = vcmp.gt.f32.partialorder %v402_v23, 20.0 }
  0xf6   : > { %v405_v25 = vmul.f32 1.442695, %v404_v24  ;;  %v843_v24 = vld [vmem:[%s1519_s8] ss:$0 sm:$0xff] }
  0xf8   : > { %1031 = vpow2.f32 %v405_v25 }
 0x102   : > { %v1032_v26 = vpop.eup %1031 }
 0x103   : > { %v407_v27 = vadd.f32 1.0, %v1032_v26  ;;  %v410_v28 = vmul.f32 -0.5, %v1032_v26  ;;  %v413_v30 = vand.u32 2147483647, %v1032_v26 }
 0x105   : > { %1033 = vlog2.f32 %v407_v27  ;;  %v411_v29 = vadd.f32 1.0, %v410_v28  ;;  %vm414_vm2 = vcmp.lt.f32.partialorder %v413_v30, 0.0004427343 }
 0x107   : > { %v412_v33 = vmul.f32 %v1032_v26, %v411_v29 }
 0x10f   : > { %v1034_v31 = vpop.eup %1033 }
 0x110   : > { %v409_v32 = vmul.f32 0.6931472, %v1034_v31 }
 0x112   : > { %v415_v34 = vsel %vm414_vm2, %v412_v33, %v409_v32 }
 0x113   : > { %v416_v35 = vsel %vm403_vm4, %v402_v23, %v415_v34 }
 0x114   : > { %889 = vmatmul.mubr.msk.f32.vlgmr.msra.gmra.mrb[0].mxu0 %vm431_vm3, %v416_v35 }
 0x115   : > { %922 = vmatprep.mubr.msk.f32.mxu0 %vm1207_vm0, %v1208_v9  ;;  %945 = vmatpush3.bf16.msra.mxu0 %v944_v0 }
 0x116   : > { %946 = vmatprep.subr.bf16.mxu0 %v1206_v6 }
 0x119   : > { %948 = vmatpush3.bf16.msra.mxu0 %v947_v3 }
 0x11a   : > { %949 = vmatprep.subr.bf16.mxu0 %v1206_v6 }
 0x11d   : > { %951 = vmatpush3.bf16.msra.mxu0 %v950_v7 }
 0x11e   : > { %920 = vmatprep.subr.mxu0 %v1208_v9 }
 0x121   : > { %921 = vmatpush3.msk.msra.mxu0 %vm435_vm1, %v633_v8 }
 0x1e7   : > { %v505_v47 = vpop.f32.mrb[0].mxu0 }
 0x1e8   : > { %v506_v48 = vadd.f32 %v837_v46, %v505_v47  ;;  %v890_v49 = vpop.f32.mrb[1].mxu0 }
 0x1ea   : > { %v510_v50 = vmin.f32 %v506_v48, 20.0  ;;  %vm509_vm6 = vcmp.gt.f32.partialorder %v506_v48, 20.0 }
 0x1ec   : > { %v511_v51 = vmul.f32 1.442695, %v510_v50 }
 0x1ee   : > { %1035 = vpow2.f32 %v511_v51 }
 0x1f8   : > { %v1036_v52 = vpop.eup %1035 }
 0x1f9   : > { %v513_v53 = vadd.f32 1.0, %v1036_v52  ;;  %v516_v54 = vmul.f32 -0.5, %v1036_v52  ;;  %v519_v56 = vand.u32 2147483647, %v1036_v52 }
 0x1fb   : > { %1037 = vlog2.f32 %v513_v53  ;;  %v517_v55 = vadd.f32 1.0, %v516_v54  ;;  %vm520_vm5 = vcmp.lt.f32.partialorder %v519_v56, 0.0004427343 }
 0x1fd   : > { %v518_v59 = vmul.f32 %v1036_v52, %v517_v55 }
 0x205   : > { %v1038_v57 = vpop.eup %1037 }
 0x206   : > { %v515_v58 = vmul.f32 0.6931472, %v1038_v57 }
 0x208   : > { %v521_v60 = vsel %vm520_vm5, %v518_v59, %v515_v58 }
 0x209   : > { %v522_v61 = vsel %vm509_vm6, %v506_v48, %v521_v60 }
 0x20a   : > { %906 = vmatmul.mubr.msk.f32.vlgmr.msra.gmra.mrb[0].mxu1 %vm431_vm3, %v522_v61 }
 0x2dd   : > { %v609_v11 = vpop.f32.mrb[0].mxu1 }
 0x2de   : > { %v610_v12 = vadd.f32 %v840_v10, %v609_v11  ;;  %v907_v13 = vpop.f32.mrb[1].mxu1 }
 0x2e0   : > { %v614_v14 = vmin.f32 %v610_v12, 20.0  ;;  %vm613_vm8 = vcmp.gt.f32.partialorder %v610_v12, 20.0 }
 0x2e2   : > { %v615_v15 = vmul.f32 1.442695, %v614_v14 }
 0x2e4   : > { %1039 = vpow2.f32 %v615_v15 }
 0x2ee   : > { %v1040_v6 = vpop.eup %1039 }
 0x2ef   : > { %v617_v16 = vadd.f32 1.0, %v1040_v6  ;;  %v620_v17 = vmul.f32 -0.5, %v1040_v6  ;;  %v623_v18 = vand.u32 2147483647, %v1040_v6 }
 0x2f1   : > { %1041 = vlog2.f32 %v617_v16  ;;  %v621_v9 = vadd.f32 1.0, %v620_v17  ;;  %vm624_vm7 = vcmp.lt.f32.partialorder %v623_v18, 0.0004427343 }
 0x2f3   : > { %v622_v21 = vmul.f32 %v1040_v6, %v621_v9 }
 0x2fb   : > { %v1042_v19 = vpop.eup %1041 }
 0x2fc   : > { %v619_v20 = vmul.f32 0.6931472, %v1042_v19 }
 0x2fe   : > { %v625_v22 = vsel %vm624_vm7, %v622_v21, %v619_v20 }
 0x2ff   : > { %v626_v23 = vsel %vm613_vm8, %v610_v12, %v625_v22 }
 0x300   : > { %923 = vmatmul.mubr.msk.f32.vlgmr.msra.gmra.mrb[2].mxu0 %vm431_vm3, %v626_v23 }
 0x3d3   : > { %v713_v25 = vpop.f32.mrb[2].mxu0 }
 0x3d4   : > { %v714_v26 = vadd.f32 %v843_v24, %v713_v25  ;;  %v924_v27 = vpop.f32.mrb[3].mxu0 }
 0x3d6   : > { %717 = vst [vmem:[%s367_s28] sm:$0xff] %v714_v26 }
 0x3d7   : > { %1140 = shalt.err (!%p1137_p9)
}
 0x3d8   : > { %s1141_s27 = scalar_lea.hbm %s1469_s15, 128  ;;  %s1145_s26 = scalar_lea.hbm %s1520_s9, 256 }
 0x3d9   : > { %p1142_p2 = scmp.ne.s32.totalorder %s1469_s15, %s1141_s27  ;;  %p1146_p5 = scmp.lt.u32.totalorder %s1469_s15, %s1520_s9 }
 0x3da   : > { %p1147_p10 = scmp.lt.u32.totalorder %s1145_s26, %s1141_s27  ;;  %p1149_p12 = scmp.lt.u32.totalorder %s1141_s27, %s1469_s15 }
 0x3db   : > { %p1143_p0 = pnand %p1142_p2, %p1544_p7 }
 0x3dc   : > { %p1148_p4 = por %p1147_p10, %p1146_p5 }
 0x3dd   : > { %p1144_p3 = pneg %p1143_p0 }
 0x3de   : > { %p1150_p8 = por %p1149_p12, %p1148_p4 }
 0x3e0   : > { %p1151_p11 = pnand %p1150_p8, %p1144_p3 }
 0x3e2   : > { %1154 = shalt.err (!%p1151_p11)
}
 0x3e3   : > { %964 = dma.vmem_to_hbm [thread:$0]  (%p1544_p7), %s1471_s14, 128, %s1469_s15, %s719_s20  }
 0x3e4 PF: > { %s1545_s21 = sld [smem:[#allocation12_spill]]  ;;  %s1546_s24 = sld [smem:[#allocation16_spill]] }
 0x3e5   : > { %p986_p13 = scmp.ge.s32.totalorder %s1197_s12, 2 }
 0x3ea   : > { %s744_s28 = sand.u32 1, %s1545_s21   ;;  %p1547_p1 = scmp.ne.s32.totalorder %s1546_s24, 0 }
 0x3eb   : > { %s745_s16 = scalar_lea.sflag [#allocation4], %s744_s28 }
 0x3ec   : > { %p977_p6 = pnand %p986_p13, %p1547_p1 }
 0x3ee   : > { %1180 = dma.done.wait (!%p977_p6), %s745_s16, 128  }
 0x3ef   : > { %1182 = vsyncadd (!%p977_p6), %s745_s16, 4294967168  ;;  %s1548_s12 = sld [smem:[#allocation14_spill]]  ;;  %s1549_s11 = sld [smem:[#allocation13_spill]] }
 0x3f0   : > { %s1550_s17 = sld [smem:[#allocation15_spill]]  ;;  %s1551_s30 = smov %s1189_s10 }
 0x3f5   : > { %p21_p9 = scmp.ge.s32.totalorder %s1548_s12, 4   ;;  %s1552_s10 = smov %s1549_s11 }
 0x3f6   : > { %s1553_s11 = smov %s1550_s17 }
 0x3f7   :  { %23 = sbr.rel (!%p21_p9) target bundleno = 5 (0x5), region = 104 }
 0x3fe   :  { %750 = vsyncpa [#allocation3], 1 }
 0x3ff   :  { %752 = vsyncpa [#allocation3 + $0x1], 1 }
 0x400   :  { %753 = vsyncpa [#allocation6], 1 }
 0x401   :  { %754 = vsyncpa [#allocation4], 1 }
 0x402   :  { %756 = vsyncpa [#allocation4 + $0x1], 1 }

</bundles_post_ra>
